<compile_context>
chip_gen: v5e
topology: v5e:2x2
jax: 0.10.0
libtpu: 0.0.40
codegen_flags: <defaults>
</compile_context>

<pallas_src>
import numpy as np
import jax
import jax.numpy as jnp
from jax.experimental import pallas as pl
from jax.experimental.pallas import tpu as pltpu


# ----------------------------- configuration ------------------------------
SAMPLE_RATE = 16000
N_FFT = 64
WIN_LENGTH = 64
HOP_LENGTH = 16
N_MELS = 8
N_FREQ = N_FFT // 2 + 1          # onesided rfft bins
LANE = 128                       # lane-padded fused basis / mel width
SIN_OFFSET = 64                  # sin block starts at lane 64 (>= N_FREQ)


# --------------------------- deterministic params --------------------------
def _hann_window(n: int) -> np.ndarray:
    # torch.hann_window(periodic=True)
    k = np.arange(n, dtype=np.float64)
    return 0.5 * (1.0 - np.cos(2.0 * np.pi * k / n))


def _dft_bases():
    # windowed real-DFT bases: (n_fft, n_freq)
    win = np.zeros(N_FFT, dtype=np.float64)
    win[:WIN_LENGTH] = _hann_window(WIN_LENGTH)
    n = np.arange(N_FFT, dtype=np.float64)[:, None]
    k = np.arange(N_FREQ, dtype=np.float64)[None, :]
    ang = 2.0 * np.pi * n * k / N_FFT
    cos_b = (win[:, None] * np.cos(ang)).astype(np.float32)
    sin_b = (win[:, None] * np.sin(ang)).astype(np.float32)
    return cos_b, sin_b


def _mel_filterbank() -> np.ndarray:
    # torchaudio.functional.melscale_fbanks: HTK mel scale, norm=None
    f_min, f_max = 0.0, SAMPLE_RATE / 2.0

    def hz_to_mel(f):
        return 2595.0 * np.log10(1.0 + f / 700.0)

    def mel_to_hz(m):
        return 700.0 * (10.0 ** (m / 2595.0) - 1.0)

    all_freqs = np.linspace(0.0, SAMPLE_RATE / 2.0, N_FREQ)
    m_pts = np.linspace(hz_to_mel(f_min), hz_to_mel(f_max), N_MELS + 2)
    f_pts = mel_to_hz(m_pts)
    f_diff = f_pts[1:] - f_pts[:-1]                       # (n_mels+1,)
    slopes = f_pts[None, :] - all_freqs[:, None]          # (n_freq, n_mels+2)
    down = -slopes[:, :-2] / f_diff[:-1]
    up = slopes[:, 2:] / f_diff[1:]
    fb = np.maximum(0.0, np.minimum(down, up))            # (n_freq, n_mels)
    return fb.astype(np.float32)


def _fused_basis_and_fb():
    # basis128: (n_fft, 128) -- cos in lanes [0, N_FREQ), sin in
    #           lanes [SIN_OFFSET, SIN_OFFSET+N_FREQ), zeros elsewhere.
    # fb128   : (128, 128)   -- fb stacked in the matching row blocks,
    #           columns >= N_MELS are zero, so that
    #   square(frames @ basis128) @ fb128 == [(re^2 + im^2) @ fb, 0...]
    cos_b, sin_b = _dft_bases()
    basis = np.zeros((N_FFT, LANE), dtype=np.float32)
    basis[:, :N_FREQ] = cos_b
    basis[:, SIN_OFFSET:SIN_OFFSET + N_FREQ] = sin_b

    fb = _mel_filterbank()
    fb128 = np.zeros((LANE, LANE), dtype=np.float32)
    fb128[:N_FREQ, :N_MELS] = fb
    fb128[SIN_OFFSET:SIN_OFFSET + N_FREQ, :N_MELS] = fb
    return basis, fb128


# ------------------------------- Pallas kernel -----------------------------
def _mel_l1_kernel(frames_ref, basis_ref, fb_ref, mel_ref, loss_ref):
    # frames_ref: (2*rows_p, n_fft)  rows [0, rows_p) -> input frames,
    #                                rows [rows_p, 2*rows_p) -> target frames
    # basis_ref : (n_fft, 128)  fused windowed cos/sin DFT basis
    # fb_ref    : (128, 128)    stacked, lane-padded mel filterbank
    spec = jnp.dot(frames_ref[...], basis_ref[...],
                   preferred_element_type=jnp.float32)     # (2*rows_p, 128)
    power = spec * spec                                    # re^2 / im^2 lanes
    mel = jnp.dot(power, fb_ref[...],
                  preferred_element_type=jnp.float32)      # (2*rows_p, 128)
    mel_ref[...] = mel                                     # lane-dense store

    half = mel.shape[0] // 2                               # rows_p (static)
    diff = jnp.abs(mel[:half, :] - mel[half:, :])          # zeros in pad lanes
    loss_ref[...] = jnp.sum(diff).reshape(1, 1)


# ------------------------------- glue / wrapper -----------------------------
def _extract_frames(x: jnp.ndarray) -> jnp.ndarray:
    # center=True, reflect padding (torch.stft semantics)
    pad = N_FFT // 2
    xp = jnp.pad(x, ((0, 0), (pad, pad)), mode="reflect")
    t_padded = xp.shape[1]
    n_frames = 1 + (t_padded - N_FFT) // HOP_LENGTH
    idx = (jnp.arange(n_frames)[:, None] * HOP_LENGTH
           + jnp.arange(N_FFT)[None, :])                   # (n_frames, n_fft)
    return xp[:, idx]                                      # (B, n_frames, n_fft)


def mel_l1_loss(waveform_in: jnp.ndarray, waveform_tgt: jnp.ndarray):
    """Returns (loss, {'mel_reconstructed': ..., 'mel_original': ...})."""
    basis_np, fb_np = _fused_basis_and_fb()
    basis = jnp.asarray(basis_np)
    fb128 = jnp.asarray(fb_np)

    frames_in = _extract_frames(waveform_in.astype(jnp.float32))
    frames_tgt = _extract_frames(waveform_tgt.astype(jnp.float32))
    B, F, _ = frames_in.shape
    rows = B * F
    rows_p = ((rows + 7) // 8) * 8                         # sublane-aligned rows

    def flat_pad(fr):
        fr = fr.reshape(rows, N_FFT)
        return jnp.pad(fr, ((0, rows_p - rows), (0, 0)))   # zero frames -> 0 loss

    frames_all = jnp.concatenate([flat_pad(frames_in), flat_pad(frames_tgt)],
                                 axis=0)                   # (2*rows_p, n_fft)

    full2 = lambda i: (0, 0)

    mel_all, loss_sum = pl.pallas_call(
        _mel_l1_kernel,
        out_shape=(
            jax.ShapeDtypeStruct((2 * rows_p, LANE), jnp.float32),
            jax.ShapeDtypeStruct((1, 1), jnp.float32),
        ),
        grid_spec=pltpu.PrefetchScalarGridSpec(
            num_scalar_prefetch=0,
            grid=(1,),                                     # single step: no pipeline overhead
            in_specs=[
                pl.BlockSpec((2 * rows_p, N_FFT), full2),
                pl.BlockSpec((N_FFT, LANE), full2),
                pl.BlockSpec((LANE, LANE), full2),
            ],
            out_specs=(
                pl.BlockSpec((2 * rows_p, LANE), full2),
                pl.BlockSpec((1, 1), full2),
            ),
        ),
        compiler_params=pltpu.CompilerParams(
            dimension_semantics=("arbitrary",)),
    )(frames_all, basis, fb128)

    # F.l1_loss mean normalization (padded rows/lanes contribute exactly 0)
    loss = loss_sum[0, 0] / jnp.float32(rows * N_MELS)

    mel_in = mel_all[:rows, :N_MELS].reshape(B, F, N_MELS)
    mel_tgt = mel_all[rows_p:rows_p + rows, :N_MELS].reshape(B, F, N_MELS)

    # torchaudio MelSpectrogram layout: (B, n_mels, n_frames)
    features = {
        "mel_reconstructed": jnp.transpose(mel_in, (0, 2, 1)),
        "mel_original": jnp.transpose(mel_tgt, (0, 2, 1)),
    }
    return loss, features


mel_l1_loss_jit = jax.jit(mel_l1_loss)


# ----------------------------------- main -----------------------------------
if __name__ == "__main__":
    key = jax.random.PRNGKey(0)
    k1, k2 = jax.random.split(key)
    B, T = 2, 256
    wav_in = jax.random.normal(k1, (B, T), dtype=jnp.float32)
    wav_tgt = jax.random.normal(k2, (B, T), dtype=jnp.float32)

    loss, feats = mel_l1_loss_jit(wav_in, wav_tgt)
    jax.block_until_ready(loss)
    jax.block_until_ready(feats["mel_reconstructed"])
    jax.block_until_ready(feats["mel_original"])

    # quick sanity check against a pure-JAX reference
    def ref_mel(x):
        pad = N_FFT // 2
        xp = jnp.pad(x, ((0, 0), (pad, pad)), mode="reflect")
        nF = 1 + (xp.shape[1] - N_FFT) // HOP_LENGTH
        idx = jnp.arange(nF)[:, None] * HOP_LENGTH + jnp.arange(N_FFT)[None, :]
        fr = xp[:, idx]
        cos_np, sin_np = _dft_bases()
        re = fr @ jnp.asarray(cos_np)
        im = fr @ jnp.asarray(sin_np)
        return (re * re + im * im) @ jnp.asarray(_mel_filterbank())

    m_a, m_b = ref_mel(wav_in), ref_mel(wav_tgt)
    ref_loss = jnp.mean(jnp.abs(m_a - m_b))
    assert jnp.allclose(loss, ref_loss, rtol=1e-4, atol=1e-4), (loss, ref_loss)
    assert jnp.allclose(feats["mel_reconstructed"],
                        jnp.transpose(m_a, (0, 2, 1)), rtol=1e-4, atol=1e-4)
    assert jnp.allclose(feats["mel_original"],
                        jnp.transpose(m_b, (0, 2, 1)), rtol=1e-4, atol=1e-4)

    print("KERNEL_OK")
</pallas_src>

<mosaic_0001>
module attributes {stable_mosaic.version = 11 : i64} {
  func.func @_mel_l1_kernel(%arg0: i32, %arg1: memref<80x64xf32, #tpu.memory_space<vmem>>, %arg2: memref<64x128xf32, #tpu.memory_space<vmem>>, %arg3: memref<128x128xf32, #tpu.memory_space<vmem>>, %arg4: memref<80x128xf32, #tpu.memory_space<vmem>>, %arg5: memref<1x1xf32, #tpu.memory_space<vmem>>) attributes {dimension_semantics = [#tpu.dimension_semantics<arbitrary>], iteration_bounds = array<i64: 1>, scalar_prefetch = 0 : i64, scratch_operands = 0 : i64, tpu.core_type = #tpu.core_type<tc>, window_params = [{pipeline_mode = #tpu.pipeline_mode<synchronous>, transform_indices = @transform_0, window_bounds = array<i64: 80, 64>}, {pipeline_mode = #tpu.pipeline_mode<synchronous>, transform_indices = @transform_1, window_bounds = array<i64: 64, 128>}, {pipeline_mode = #tpu.pipeline_mode<synchronous>, transform_indices = @transform_2, window_bounds = array<i64: 128, 128>}, {pipeline_mode = #tpu.pipeline_mode<synchronous>, transform_indices = @transform_3, window_bounds = array<i64: 80, 128>}, {pipeline_mode = #tpu.pipeline_mode<synchronous>, transform_indices = @transform_4, window_bounds = array<i64: 1, 1>}]} {
    %c0 = arith.constant 0 : index
    %c0_0 = arith.constant 0 : index
    %0 = vector.load %arg1[%c0, %c0_0] : memref<80x64xf32, #tpu.memory_space<vmem>>, vector<80x64xf32>
    %c0_1 = arith.constant 0 : index
    %c0_2 = arith.constant 0 : index
    %1 = vector.load %arg2[%c0_1, %c0_2] : memref<64x128xf32, #tpu.memory_space<vmem>>, vector<64x128xf32>
    %cst = arith.constant dense<0.000000e+00> : vector<80x128xf32>
    %2 = tpu.matmul %0, %1, %cst {dimension_numbers = #tpu.dot_dimension_numbers<[1], [0], [0], [1], [0, 0, 1, 1], [], []>} : vector<80x64xf32>, vector<64x128xf32>, vector<80x128xf32> -> vector<80x128xf32>
    %3 = arith.mulf %2, %2 : vector<80x128xf32>
    %c0_3 = arith.constant 0 : index
    %c0_4 = arith.constant 0 : index
    %4 = vector.load %arg3[%c0_3, %c0_4] : memref<128x128xf32, #tpu.memory_space<vmem>>, vector<128x128xf32>
    %cst_5 = arith.constant dense<0.000000e+00> : vector<80x128xf32>
    %5 = tpu.matmul %3, %4, %cst_5 {dimension_numbers = #tpu.dot_dimension_numbers<[1], [0], [0], [1], [0, 0, 1, 1], [], []>} : vector<80x128xf32>, vector<128x128xf32>, vector<80x128xf32> -> vector<80x128xf32>
    %c0_6 = arith.constant 0 : index
    %c0_7 = arith.constant 0 : index
    %6 = vector.load %arg4[%c0_6, %c0_7] : memref<80x128xf32, #tpu.memory_space<vmem>>, vector<80x128xf32>
    tpu.vector_store %arg4[%c0_6, %c0_7], %5 {strides = array<i32>} : memref<80x128xf32, #tpu.memory_space<vmem>>, vector<80x128xf32>,
    %7 = vector.extract_strided_slice %5 {offsets = [0, 0], sizes = [40, 128], strides = [1, 1]} : vector<80x128xf32> to vector<40x128xf32>
    %8 = vector.extract_strided_slice %5 {offsets = [40, 0], sizes = [40, 128], strides = [1, 1]} : vector<80x128xf32> to vector<40x128xf32>
    %9 = arith.subf %7, %8 : vector<40x128xf32>
    %10 = math.absf %9 : vector<40x128xf32>
    %11 = vector.shape_cast %10 : vector<40x128xf32> to vector<1x40x128xf32>
    %cst_8 = arith.constant dense<0.000000e+00> : vector<1xf32>
    %12 = vector.multi_reduction <add>, %11, %cst_8 [1, 2] : vector<1x40x128xf32> to vector<1xf32>
    %13 = vector.shape_cast %12 : vector<1xf32> to vector<1x1x1xf32>
    %14 = vector.extract %13[0, 0, 0] : f32 from vector<1x1x1xf32>
    %15 = vector.broadcast %14 : f32 to vector<1x1xf32>
    %c0_9 = arith.constant 0 : index
    %c0_10 = arith.constant 0 : index
    %16 = vector.load %arg5[%c0_9, %c0_10] : memref<1x1xf32, #tpu.memory_space<vmem>>, vector<1x1xf32>
    tpu.vector_store %arg5[%c0_9, %c0_10], %15 {strides = array<i32>} : memref<1x1xf32, #tpu.memory_space<vmem>>, vector<1x1xf32>,
    return
  }
  func.func @transform_0(%arg0: i32) -> (i32, i32) {
    %c0_i32 = arith.constant 0 : i32
    %c0_i32_0 = arith.constant 0 : i32
    %c0_i32_1 = arith.constant 0 : i32
    return %c0_i32, %c0_i32_0 : i32, i32
  }
  func.func @transform_1(%arg0: i32) -> (i32, i32) {
    %c0_i32 = arith.constant 0 : i32
    %c0_i32_0 = arith.constant 0 : i32
    %c0_i32_1 = arith.constant 0 : i32
    return %c0_i32, %c0_i32_0 : i32, i32
  }
  func.func @transform_2(%arg0: i32) -> (i32, i32) {
    %c0_i32 = arith.constant 0 : i32
    %c0_i32_0 = arith.constant 0 : i32
    %c0_i32_1 = arith.constant 0 : i32
    return %c0_i32, %c0_i32_0 : i32, i32
  }
  func.func @transform_3(%arg0: i32) -> (i32, i32) {
    %c0_i32 = arith.constant 0 : i32
    %c0_i32_0 = arith.constant 0 : i32
    %c0_i32_1 = arith.constant 0 : i32
    return %c0_i32, %c0_i32_0 : i32, i32
  }
  func.func @transform_4(%arg0: i32) -> (i32, i32) {
    %c0_i32 = arith.constant 0 : i32
    %c0_i32_0 = arith.constant 0 : i32
    %c0_i32_1 = arith.constant 0 : i32
    return %c0_i32, %c0_i32_0 : i32, i32
  }
}

</mosaic_0001>

<bundles_post_ra>
// kernel: mel_l1_loss.1
= control target key start
LH: loop header
LB: loop body
LE: loop exit
PB: predicated region body
PF: predicated region fallthrough
CT: control target
= control target key end

     0   :  { %s492_s0 = inlined_call_operand.vmem [shape: f32[80,64], index: 0, kind: input, shape index: {}]   ;;  %s493_s1 = inlined_call_operand.vmem [shape: f32[64,128], index: 1, kind: input, shape index: {}]   ;;  %s494_s2 = inlined_call_operand.vmem [shape: f32[128,128], index: 2, kind: input, shape index: {}]   ;;  %s495_s3 = inlined_call_operand.vmem [shape: f32[80,128], index: 3, kind: output, shape index: {0}]   ;;  %s496_s4 = inlined_call_operand.hbm [shape: f32[1,1], index: 4, kind: output, shape index: {1}]  }
   0x1   :  { %v34_v0 = vld [vmem:[%s493_s1 + $0x38] sm:$0xff]  ;;  %v33_v1 = vld [vmem:[%s493_s1 + $0x30] sm:$0xff]  ;;  %v32_v2 = vld [vmem:[%s493_s1 + $0x28] sm:$0xff] }
   0x2   :  { %74 = vmatpush.msra.mxu0 %v34_v0  ;;  %252 = vmatpush.msra.mxu3 %v34_v0  ;;  %v31_v3 = vld [vmem:[%s493_s1 + $0x20] sm:$0xff] }
   0x4   :  { %75 = vmatpush.msra.mxu0 %v33_v1  ;;  %253 = vmatpush.msra.mxu3 %v33_v1 }
   0x6   :  { %76 = vmatpush.msra.mxu0 %v32_v2  ;;  %254 = vmatpush.msra.mxu3 %v32_v2 }
   0x7   :  { %10 = vsyncpa [#allocation3], 0  ;;  %v30_v4 = vld [vmem:[%s493_s1 + $0x18] sm:$0xff]  ;;  %v29_v5 = vld [vmem:[%s493_s1 + $0x10] sm:$0xff]  ;;  %vm35_vm0 = vcmask 523264   ;;  %s321_s20 = smov [#allocation2]  }
   0x8   :  { %77 = vmatpush.msra.mxu0 %v31_v3  ;;  %255 = vmatpush.msra.mxu3 %v31_v3  ;;  %v28_v6 = vld [vmem:[%s493_s1 + $0x8] sm:$0xff]  ;;  %v27_v7 = vld [vmem:[%s493_s1] sm:$0xff]  ;;  %v23_v9 = vld [vmem:[%s492_s0 + $0x30] sm:$0xff]  ;;  %s231_s23 = sshll.u32 %s496_s4, 4  ;;  %vm220_vm1 = vcmask 0   ;;  %s232_s23 = int_to_ptr.hbm [resolvable:$true] %s231_s23 }
   0x9   :  { %v17_v8 = vld [vmem:[%s492_s0] sm:$0xff]  ;;  %v18_v10 = vld [vmem:[%s492_s0 + $0x8] sm:$0xff]  ;;  %v24_v11 = vld [vmem:[%s492_s0 + $0x38] sm:$0xff] }
   0xa   :  { %78 = vmatpush.msra.mxu0 %v30_v4  ;;  %256 = vmatpush.msra.mxu3 %v30_v4  ;;  %v138_v12 = vld [vmem:[%s494_s2 + $0x78] sm:$0xff]  ;;  %v137_v13 = vld [vmem:[%s494_s2 + $0x70] sm:$0xff]  ;;  %v136_v14 = vld [vmem:[%s494_s2 + $0x68] sm:$0xff] }
   0xb   :  { %139 = vmatpush.msra.mxu1 %v138_v12  ;;  %260 = vmatpush.msra.mxu2 %v138_v12  ;;  %v135_v15 = vld [vmem:[%s494_s2 + $0x60] sm:$0xff]  ;;  %v19_v16 = vld [vmem:[%s492_s0 + $0x10] sm:$0xff]  ;;  %v134_v18 = vld [vmem:[%s494_s2 + $0x58] sm:$0xff] }
   0xc   :  { %79 = vmatpush.msra.mxu0 %v29_v5  ;;  %257 = vmatpush.msra.mxu3 %v29_v5  ;;  %v25_v17 = vld [vmem:[%s492_s0 + $0x40] sm:$0xff]  ;;  %v133_v19 = vld [vmem:[%s494_s2 + $0x50] sm:$0xff]  ;;  %v132_v20 = vld [vmem:[%s494_s2 + $0x48] sm:$0xff] }
   0xd   :  { %140 = vmatpush.msra.mxu1 %v137_v13  ;;  %262 = vmatpush.msra.mxu2 %v137_v13  ;;  %v131_v21 = vld [vmem:[%s494_s2 + $0x40] sm:$0xff]  ;;  %v20_v22 = vld [vmem:[%s492_s0 + $0x18] sm:$0xff]  ;;  %v26_v23 = vld [vmem:[%s492_s0 + $0x48] sm:$0xff] }
   0xe   :  { %80 = vmatpush.msra.mxu0 %v28_v6  ;;  %258 = vmatpush.msra.mxu3 %v28_v6  ;;  %v130_v24 = vld [vmem:[%s494_s2 + $0x38] sm:$0xff]  ;;  %v129_v25 = vld [vmem:[%s494_s2 + $0x30] sm:$0xff]  ;;  %v128_v26 = vld [vmem:[%s494_s2 + $0x28] sm:$0xff] }
   0xf   :  { %141 = vmatpush.msra.mxu1 %v136_v14  ;;  %264 = vmatpush.msra.mxu2 %v136_v14  ;;  %v127_v27 = vld [vmem:[%s494_s2 + $0x20] sm:$0xff]  ;;  %v126_v29 = vld [vmem:[%s494_s2 + $0x18] sm:$0xff]  ;;  %v125_v30 = vld [vmem:[%s494_s2 + $0x10] sm:$0xff] }
  0x10   :  { %81 = vmatpush.msra.mxu0 %v27_v7  ;;  %259 = vmatpush.msra.mxu3 %v27_v7  ;;  %v21_v28 = vld [vmem:[%s492_s0 + $0x20] sm:$0xff]  ;;  %v22_v31 = vld [vmem:[%s492_s0 + $0x28] sm:$0xff] }
  0x11   :  { %242 = vmatmul.msk.f32.vlgmr.msra.gmra.mxu0 %vm35_vm0, %v17_v8  ;;  %248 = vmatmul.msk.f32.vlgmr.msra.gmra.mxu3 %vm35_vm0, %v23_v9  ;;  %v124_v32 = vld [vmem:[%s494_s2 + $0x8] sm:$0xff]  ;;  %v123_v33 = vld [vmem:[%s494_s2] sm:$0xff] }
  0x12   :  { %261 = vmatpush.msrb.mxu3 %v138_v12  ;;  %142 = vmatpush.msra.mxu1 %v135_v15 }
  0x13   :  { %266 = vmatpush.msra.mxu2 %v135_v15 }
  0x14   :  { %263 = vmatpush.msrb.mxu3 %v137_v13  ;;  %143 = vmatpush.msra.mxu1 %v134_v18 }
  0x15   :  { %268 = vmatpush.msra.mxu2 %v134_v18 }
  0x16   :  { %265 = vmatpush.msrb.mxu3 %v136_v14  ;;  %144 = vmatpush.msra.mxu1 %v133_v19 }
  0x17   :  { %270 = vmatpush.msra.mxu2 %v133_v19 }
  0x18   :  { %267 = vmatpush.msrb.mxu3 %v135_v15  ;;  %145 = vmatpush.msra.mxu1 %v132_v20 }
  0x19   :  { %243 = vmatmul.msk.f32.gmra.mxu0 %vm35_vm0, %v18_v10  ;;  %249 = vmatmul.msk.f32.gmra.mxu3 %vm35_vm0, %v24_v11 }
  0x1a   :  { %269 = vmatpush.msrb.mxu3 %v134_v18  ;;  %146 = vmatpush.msra.mxu1 %v131_v21 }
  0x1b   :  { %272 = vmatpush.msra.mxu2 %v132_v20 }
  0x1c   :  { %271 = vmatpush.msrb.mxu3 %v133_v19  ;;  %147 = vmatpush.msra.mxu1 %v130_v24 }
  0x1d   :  { %274 = vmatpush.msra.mxu2 %v131_v21 }
  0x1e   :  { %273 = vmatpush.msrb.mxu3 %v132_v20  ;;  %148 = vmatpush.msra.mxu1 %v129_v25 }
  0x1f   :  { %276 = vmatpush.msra.mxu2 %v130_v24 }
  0x20   :  { %275 = vmatpush.msrb.mxu3 %v131_v21  ;;  %149 = vmatpush.msra.mxu1 %v128_v26 }
  0x21   :  { %244 = vmatmul.msk.f32.gmra.mxu0 %vm35_vm0, %v19_v16  ;;  %250 = vmatmul.msk.f32.gmra.mxu3 %vm35_vm0, %v25_v17 }
  0x22   :  { %277 = vmatpush.msrb.mxu3 %v130_v24  ;;  %150 = vmatpush.msra.mxu1 %v127_v27 }
  0x23   :  { %278 = vmatpush.msra.mxu2 %v129_v25 }
  0x24   :  { %279 = vmatpush.msrb.mxu3 %v129_v25  ;;  %151 = vmatpush.msra.mxu1 %v126_v29 }
  0x25   :  { %280 = vmatpush.msra.mxu2 %v128_v26 }
  0x26   :  { %281 = vmatpush.msrb.mxu3 %v128_v26  ;;  %152 = vmatpush.msra.mxu1 %v125_v30 }
  0x27   :  { %282 = vmatpush.msra.mxu2 %v127_v27 }
  0x28   :  { %283 = vmatpush.msrb.mxu3 %v127_v27  ;;  %153 = vmatpush.msra.mxu1 %v124_v32 }
  0x29   :  { %245 = vmatmul.msk.f32.gmra.mxu0 %vm35_vm0, %v20_v22  ;;  %251 = vmatmul.msk.f32.gmra.mxu3 %vm35_vm0, %v26_v23 }
  0x2a   :  { %285 = vmatpush.msrb.mxu3 %v126_v29  ;;  %284 = vmatpush.msra.mxu2 %v126_v29 }
  0x2b   :  { %154 = vmatpush.msra.mxu1 %v123_v33 }
  0x2c   :  { %287 = vmatpush.msrb.mxu3 %v125_v30  ;;  %286 = vmatpush.msra.mxu2 %v125_v30 }
  0x2e   :  { %289 = vmatpush.msrb.mxu3 %v124_v32  ;;  %288 = vmatpush.msra.mxu2 %v124_v32 }
  0x30   :  { %291 = vmatpush.msrb.mxu3 %v123_v33  ;;  %290 = vmatpush.msra.mxu2 %v123_v33 }
  0x31   :  { %246 = vmatmul.msk.f32.gmra.mxu0 %vm35_vm0, %v21_v28 }
  0x39   :  { %247 = vmatmul.msk.f32.gmra.mxu0 %vm35_vm0, %v22_v31 }
  0x8e   :  { %v83_v34 = vpop.f32.mrf.mxu0 }
  0x8f   :  { %v113_v35 = vmul.f32 %v83_v34, %v83_v34 }
  0x91   :  { %155 = vmatmul.f32.vlgmr.msra.gmra.mxu1 %v113_v35 }
  0x94   :  { %v101_v36 = vpop.f32.mrf.mxu3 }
  0x95   :  { %v119_v52 = vmul.f32 %v101_v36, %v101_v36 }
  0x96   :  { %v86_v37 = vpop.f32.mrf.mxu0 }
  0x97   :  { %v114_v38 = vmul.f32 %v86_v37, %v86_v37 }
  0x99   :  { %158 = vmatmul.f32.gmra.mxu1 %v114_v38 }
  0x9c   :  { %v104_v39 = vpop.f32.mrf.mxu3 }
  0x9d   :  { %v120_v53 = vmul.f32 %v104_v39, %v104_v39 }
  0x9e   :  { %v89_v40 = vpop.f32.mrf.mxu0 }
  0x9f   :  { %v115_v41 = vmul.f32 %v89_v40, %v89_v40 }
  0xa1   :  { %161 = vmatmul.f32.gmra.mxu1 %v115_v41 }
  0xa4   :  { %v107_v42 = vpop.f32.mrf.mxu3 }
  0xa5   :  { %v121_v43 = vmul.f32 %v107_v42, %v107_v42 }
  0xa6   :  { %v92_v44 = vpop.f32.mrf.mxu0 }
  0xa7   :  { %v116_v45 = vmul.f32 %v92_v44, %v92_v44  ;;  %179 = vmatmul.f32.vlgmr.msrb.gmra.mxu3 %v121_v43 }
  0xa9   :  { %164 = vmatmul.f32.gmra.mxu1 %v116_v45 }
  0xac   :  { %v110_v46 = vpop.f32.mrf.mxu3 }
  0xad   :  { %v122_v47 = vmul.f32 %v110_v46, %v110_v46 }
  0xae   :  { %v95_v48 = vpop.f32.mrf.mxu0 }
  0xaf   :  { %v117_v49 = vmul.f32 %v95_v48, %v95_v48  ;;  %182 = vmatmul.f32.gmra.mxu3 %v122_v47 }
  0xb1   :  { %167 = vmatmul.f32.vlgmr.msra.gmra.mxu2 %v117_v49 }
  0xb6   :  { %v98_v50 = vpop.f32.mrf.mxu0 }
  0xb7   :  { %v118_v51 = vmul.f32 %v98_v50, %v98_v50 }
  0xb9   :  { %170 = vmatmul.f32.gmra.mxu2 %v118_v51 }
  0xc1   :  { %173 = vmatmul.f32.gmra.mxu2 %v119_v52 }
  0xc9   :  { %176 = vmatmul.f32.gmra.mxu2 %v120_v53 }
 0x10e   :  { %v156_v54 = vpop.f32.mrf.mxu1 }
 0x10f   :  { %186 = vst [vmem:[%s495_s3] sm:$0xff] %v156_v54 }
 0x116   :  { %v159_v55 = vpop.f32.mrf.mxu1 }
 0x117   :  { %187 = vst [vmem:[%s495_s3 + $0x8] sm:$0xff] %v159_v55 }
 0x11e   :  { %v162_v56 = vpop.f32.mrf.mxu1 }
 0x11f   :  { %188 = vst [vmem:[%s495_s3 + $0x10] sm:$0xff] %v162_v56 }
 0x126   :  { %v165_v57 = vpop.f32.mrf.mxu1 }
 0x127   :  { %189 = vst [vmem:[%s495_s3 + $0x18] sm:$0xff] %v165_v57 }
 0x12a   :  { %v180_v58 = vpop.f32.mrf.mxu3 }
 0x12b   :  { %194 = vst [vmem:[%s495_s3 + $0x40] sm:$0xff] %v180_v58  ;;  %v199_v3 = vsub.f32 %v165_v57, %v180_v58 }
 0x12d   :  { %v204_v9 = vand.u32 2147483647, %v199_v3 }
 0x132   :  { %v183_v59 = vpop.f32.mrf.mxu3 }
 0x133   :  { %195 = vst [vmem:[%s495_s3 + $0x48] sm:$0xff] %v183_v59 }
 0x134   :  { %v168_v60 = vpop.f32.mrf.mxu2 }
 0x135   :  { %190 = vst [vmem:[%s495_s3 + $0x20] sm:$0xff] %v168_v60  ;;  %v200_v6 = vsub.f32 %v168_v60, %v183_v59 }
 0x137   :  { %v205_v11 = vand.u32 2147483647, %v200_v6 }
 0x13c   :  { %v171_v61 = vpop.f32.mrf.mxu2 }
 0x13d   :  { %191 = vst [vmem:[%s495_s3 + $0x28] sm:$0xff] %v171_v61  ;;  %v196_v0 = vsub.f32 %v156_v54, %v171_v61 }
 0x13f   :  { %v201_v4 = vand.u32 2147483647, %v196_v0 }
 0x144   :  { %v174_v62 = vpop.f32.mrf.mxu2 }
 0x145   :  { %192 = vst [vmem:[%s495_s3 + $0x30] sm:$0xff] %v174_v62  ;;  %v197_v63 = vsub.f32 %v159_v55, %v174_v62 }
 0x147   :  { %v202_v1 = vand.u32 2147483647, %v197_v63 }
 0x149   :  { %v206_v7 = vadd.f32 %v202_v1, %v201_v4 }
 0x14c   :  { %v177_v2 = vpop.f32.mrf.mxu2 }
 0x14d   :  { %193 = vst [vmem:[%s495_s3 + $0x38] sm:$0xff] %v177_v2  ;;  %v198_v5 = vsub.f32 %v162_v56, %v177_v2  ;;  %s229_s3 = sshll.u32 %s321_s20, 4  ;;  %s230_s3 = int_to_ptr.vmem [resolvable:$true] %s229_s3 }
 0x14f   :  { %v203_v8 = vand.u32 2147483647, %v198_v5 }
 0x151   :  { %v207_v10 = vadd.f32 %v206_v7, %v203_v8 }
 0x153   :  { %v208_v12 = vadd.f32 %v207_v10, %v204_v9 }
 0x155   :  { %v209_v13 = vadd.f32 %v208_v12, %v205_v11 }
 0x157   :  { %210 = vadd.xlane.f32.xlu0 %v209_v13 }
 0x1ca   :  { %v211_v14 = vpop.xlane.xlu0 %210 }
 0x1cb   :  { %v212_v15 = vrot.slane %v211_v14, 4 }
 0x1cd   :  { %v213_v16 = vadd.f32 %v212_v15, %v211_v14 }
 0x1cf   :  { %v214_v17 = vrot.slane %v213_v16, 2 }
 0x1d1   :  { %v215_v18 = vadd.f32 %v214_v17, %v213_v16 }
 0x1d3   :  { %v216_v19 = vrot.slane %v215_v18, 1 }
 0x1d5   :  { %v217_v20 = vadd.f32 %v216_v19, %v215_v18 }
 0x1d7   :  { %292 = vpush %v217_v20 }
 0x208   :  { %s293_s24 = spop %292 }
 0x209   :  { %v219_v21 = vstv %s293_s24 }
 0x20a   :  { %221 = vst.msk [vmem:[#allocation2] sm:$0x1] %vm220_vm1, %v219_v21 }
 0x20b   :  { %234 = dma.vmem_to_hbm [thread:$0]  %s230_s3, 16, %s232_s23, [#allocation3]  }
 0x20c   :  { %319 = dma.done.wait [#allocation3], 16  }
 0x20d   :  { %320 = vsyncadd [#allocation3], 4294967280 }
 0x20e   :  { %241 = vsyncpa [#allocation3], 1 }

</bundles_post_ra>
